<compile_context>
chip_gen: v7x
topology: tpu7x:2x2x1
jax: 0.10.0
libtpu: 0.0.40
codegen_flags: <defaults>
</compile_context>

<pallas_src>
import functools

import jax
import jax.numpy as jnp
from jax.experimental import pallas as pl
from jax.experimental.pallas import tpu as pltpu


def _decoder_kernel(inv_sqrt_embedding_dim, logit_clipping, mm_dtype,
                    mask_is_additive, fuse_lanes,
                    scal_ref,    # SMEM (2,): [c1 = -alpha1*log_scale, c2 = alpha2*log_scale]
                    nodes_ref,   # (BB, M, E) encoded_nodes        (mm_dtype)
                    q1_ref,      # (BB, N, E) encoded_q1           (mm_dtype)
                    last_ref,    # (BB, N, E) encoded_last_node    (mm_dtype)
                    dist_ref,    # (BB, N, M) cur_dist             (f32 or bf16)
                    mask_ref,    # (BB, N, M) ninf_mask            (float additive or int8 flag)
                    wq_ref,      # (2E, E)  [Wq_first^T ; Wq_last^T]
                    wkv_ref,     # (E, 2E)  [Wk^T | Wv^T]
                    probs_ref):  # (BB, N, M) output probabilities
    c1 = scal_ref[0]
    c2 = scal_ref[1]

    nodes = nodes_ref[...]                       # (BB, M, E) mm_dtype
    BB, M, E = nodes.shape
    N = q1_ref.shape[1]

    dist = dist_ref[...].astype(jnp.float32)     # elementwise math stays f32
    if mask_is_additive:
        add_mask = mask_ref[...].astype(jnp.float32)           # 0 / -inf
    else:
        # int8 / bool flag mask -> exact 0 / -inf additive mask in-kernel.
        add_mask = jnp.where(mask_ref[...].astype(jnp.float32) != 0.0,
                             jnp.float32(-jnp.inf), jnp.float32(0.0))

    # ---- fused q projections: q = q1 @ Wq_first^T + last @ Wq_last^T ----
    wq = wq_ref[...]                             # (2E, E)
    q1_flat = q1_ref[...].reshape(BB * N, E)
    last_flat = last_ref[...].reshape(BB * N, E)
    if fuse_lanes:                               # E % 128 == 0: one MXU pass, K = 2E
        q = jnp.dot(jnp.concatenate([q1_flat, last_flat], axis=-1), wq,
                    preferred_element_type=jnp.float32)
    else:                                        # lane-aligned fallback (small E)
        q = (jnp.dot(q1_flat, wq[:E], preferred_element_type=jnp.float32)
             + jnp.dot(last_flat, wq[E:], preferred_element_type=jnp.float32))
    sigmoid_q = jax.nn.sigmoid(q.reshape(BB, N, E))             # f32

    # ---- k / v projections ----
    wkv = wkv_ref[...]                           # (E, 2E)
    nodes_flat = nodes.reshape(BB * M, E)
    if fuse_lanes:
        kv = jnp.dot(nodes_flat, wkv,
                     preferred_element_type=jnp.float32).reshape(BB, M, 2 * E)
        k = kv[:, :, :E]
        v = kv[:, :, E:]
    else:
        k = jnp.dot(nodes_flat, wkv[:, :E],
                    preferred_element_type=jnp.float32).reshape(BB, M, E)
        v = jnp.dot(nodes_flat, wkv[:, E:],
                    preferred_element_type=jnp.float32).reshape(BB, M, E)
    exp_k = jnp.exp(k)                           # f32 (EUP)

    # ---- Adaptation Attention Free Module ----
    exp_ab = jnp.exp(c1 * dist + add_mask)       # (BB, N, M); masked cols -> exactly 0
    exp_ab_mm = exp_ab.astype(mm_dtype)
    if fuse_lanes:
        # one (N, M) @ (M, 2E) matmul produces [bias | a_k]
        rhs = jnp.concatenate([(exp_k * v).astype(mm_dtype),
                               exp_k.astype(mm_dtype)], axis=-1)
        acc = jnp.einsum('bnm,bmf->bnf', exp_ab_mm, rhs,
                         preferred_element_type=jnp.float32)
        bias = acc[:, :, :E]
        a_k = acc[:, :, E:]
    else:
        bias = jnp.einsum('bnm,bme->bne', exp_ab_mm, (exp_k * v).astype(mm_dtype),
                          preferred_element_type=jnp.float32)
        a_k = jnp.einsum('bnm,bme->bne', exp_ab_mm, exp_k.astype(mm_dtype),
                         preferred_element_type=jnp.float32)
    # exp_ab >= 0, exp_k > 0 => finite non-negative; the only non-finite source
    # is the fully-masked 0/0 row, which (like torch's nan_to_num fallback) -> 0.
    weighted = jnp.where(a_k > 0.0, bias / a_k, 0.0)
    aafm = sigmoid_q * weighted                  # (BB, N, E) f32

    # ---- single-head scoring directly against encoded_nodes (no transpose) ----
    score = jnp.einsum('bne,bme->bnm', aafm.astype(mm_dtype), nodes,
                       preferred_element_type=jnp.float32)      # (BB, N, M)
    score = score * inv_sqrt_embedding_dim - c2 * dist
    score = logit_clipping * jnp.tanh(score) + add_mask

    # ---- softmax over nodes (f32) ----
    row_max = jnp.max(score, axis=-1, keepdims=True)
    e = jnp.exp(score - row_max)
    denom = jnp.sum(e, axis=-1, keepdims=True)
    probs = e * pl.reciprocal(denom, approx=True)
    probs_ref[...] = probs.astype(probs_ref.dtype)


def tsp_decoder_forward(params, model_params, encoded_nodes, encoded_q1,
                        encoded_last_node, cur_dist, log_scale, ninf_mask,
                        *, mm_dtype=jnp.bfloat16, out_dtype=jnp.float32,
                        max_batch_block=8, min_grid_steps=4):
    """Fused TSP_Decoder forward.

    mm_dtype: MXU operand / activation-stream dtype (bf16 recommended on
      v6e/v7x; f32 for bit-faithful checks).  Accumulation and elementwise
      math are always f32.
    cur_dist may be f32 or bf16; ninf_mask may be a float additive mask
      (0 / -inf) or an int8/bool flag mask (nonzero == masked).
    """
    B, N, E = encoded_last_node.shape
    M = encoded_nodes.shape[1]

    # Activation streams in the MXU operand dtype (ideally the encoder already
    # emits this dtype so these casts are no-ops / fused upstream).
    nodes_in = encoded_nodes.astype(mm_dtype)
    q1_in = encoded_q1.astype(mm_dtype)
    last_in = encoded_last_node.astype(mm_dtype)

    mask_in = ninf_mask
    if mask_in.dtype == jnp.bool_:
        mask_in = mask_in.astype(jnp.int8)
    mask_is_additive = bool(jnp.issubdtype(mask_in.dtype, jnp.floating))

    # Tiny VMEM-resident weights, pre-transposed for x @ W.
    wq_stack = jnp.concatenate([jnp.transpose(params['Wq_first']),
                                jnp.transpose(params['Wq_last'])],
                               axis=0).astype(mm_dtype)              # (2E, E)
    w_kv = jnp.concatenate([jnp.transpose(params['Wk']),
                            jnp.transpose(params['Wv'])],
                           axis=1).astype(mm_dtype)                  # (E, 2E)

    scal = jnp.concatenate([
        jnp.ravel(-params['alpha1'] * log_scale),
        jnp.ravel(params['alpha2'] * log_scale)]).astype(jnp.float32)

    # ---- per-generation VMEM-aware batch blocking ----
    vmem_cap = 64 * 1024 * 1024                      # v7x worst case
    try:
        vmem_cap = int(getattr(pltpu.get_tpu_info(), 'vmem_capacity_bytes',
                               vmem_cap))
    except Exception:
        pass
    vmem_budget = min(int(vmem_cap * 0.55), 48 * 1024 * 1024)
    vmem_limit = int(min(vmem_cap * 3 // 4, 96 * 1024 * 1024))

    s_act = jnp.dtype(mm_dtype).itemsize
    s_dist = cur_dist.dtype.itemsize
    s_mask = mask_in.dtype.itemsize
    s_out = jnp.dtype(out_dtype).itemsize
    # streamed bytes per batch element (double-buffered by the pipeline)
    stream_b = (M * E + 2 * N * E) * s_act + N * M * (s_dist + s_mask + s_out)
    # live f32 intermediates (exp_ab/score/e/probs/dist, k/v/exp_k/exp_k*v,
    # q/sigmoid_q/bias/a_k/weighted/aafm/...) plus mm_dtype copies for the MXU
    inter_b = (4 * (5 * N * M + 4 * M * E + 8 * N * E)
               + s_act * (N * M + 2 * M * E + 2 * N * E))
    bytes_per_b = 2 * stream_b + inter_b
    bb_cap = max(1, min(max_batch_block, vmem_budget // max(1, bytes_per_b)))

    # Largest divisor of B under the cap, preferring >= min_grid_steps and an
    # even number of grid steps (keeps both v7x TensorCores busy and leaves
    # steps for the DMA pipeline to overlap against).
    BB, best_key = 1, None
    for d in range(1, B + 1):
        if B % d or d > bb_cap:
            continue
        steps = B // d
        key = (steps >= min_grid_steps, steps % 2 == 0, d)
        if best_key is None or key > best_key:
            BB, best_key = d, key
    grid = (B // BB,)

    fuse_lanes = (E % 128 == 0)   # 2E-wide concat/slice tricks only when lane-aligned
    kernel = functools.partial(
        _decoder_kernel,
        float(1.0 / model_params['sqrt_embedding_dim']),
        float(model_params['logit_clipping']),
        mm_dtype, mask_is_additive, fuse_lanes)

    # NOTE: if a trace shows exposed DMA on the dist/mask streams, add
    # pipeline_mode=pl.Buffered(3) to those BlockSpecs (VMEM permitting).
    return pl.pallas_call(
        kernel,
        out_shape=jax.ShapeDtypeStruct((B, N, M), out_dtype),
        grid=grid,
        in_specs=[
            pl.BlockSpec(memory_space=pltpu.MemorySpace.SMEM),   # scalars
            pl.BlockSpec((BB, M, E), lambda b: (b, 0, 0)),       # encoded_nodes
            pl.BlockSpec((BB, N, E), lambda b: (b, 0, 0)),       # encoded_q1
            pl.BlockSpec((BB, N, E), lambda b: (b, 0, 0)),       # encoded_last_node
            pl.BlockSpec((BB, N, M), lambda b: (b, 0, 0)),       # cur_dist
            pl.BlockSpec((BB, N, M), lambda b: (b, 0, 0)),       # ninf_mask
            pl.BlockSpec((2 * E, E), lambda b: (0, 0)),          # [Wq_first^T;Wq_last^T]
            pl.BlockSpec((E, 2 * E), lambda b: (0, 0)),          # [Wk^T | Wv^T]
        ],
        out_specs=pl.BlockSpec((BB, N, M), lambda b: (b, 0, 0)),
        compiler_params=pltpu.CompilerParams(
            dimension_semantics=("parallel",),
            vmem_limit_bytes=vmem_limit),
    )(scal, nodes_in, q1_in, last_in, cur_dist, mask_in, wq_stack, w_kv)


def reference_forward(params, model_params, encoded_nodes, encoded_q1,
                      encoded_last_node, cur_dist, log_scale, ninf_mask):
    """Pure-JAX reference mirroring the PyTorch module."""
    k = jnp.einsum('bme,fe->bmf', encoded_nodes, params['Wk'])
    v = jnp.einsum('bme,fe->bmf', encoded_nodes, params['Wv'])
    shk = jnp.transpose(encoded_nodes, (0, 2, 1))
    q_first = jnp.einsum('bne,fe->bnf', encoded_q1, params['Wq_first'])
    q_last = jnp.einsum('bne,fe->bnf', encoded_last_node, params['Wq_last'])
    q = q_first + q_last
    sigmoid_q = jax.nn.sigmoid(q)
    ab = -params['alpha1'] * log_scale * cur_dist + ninf_mask
    exp_ab = jnp.exp(ab)
    exp_k = jnp.exp(k)
    bias = jnp.einsum('bnm,bme->bne', exp_ab, exp_k * v)
    a_k = jnp.einsum('bnm,bme->bne', exp_ab, exp_k)
    weighted = jnp.nan_to_num(bias / a_k)   # matches torch in all finite cases
    aafm = sigmoid_q * weighted
    score = jnp.einsum('bne,bem->bnm', aafm, shk)
    score = score / model_params['sqrt_embedding_dim'] \
        - params['alpha2'] * log_scale * cur_dist
    score = model_params['logit_clipping'] * jnp.tanh(score) + ninf_mask
    return jax.nn.softmax(score, axis=-1)


if __name__ == "__main__":
    B, N, M, E = 2, 8, 64, 32   # batch, pomo/queries, nodes, embedding_dim
    model_params = dict(
        embedding_dim=E,
        sqrt_embedding_dim=float(E) ** 0.5,
        logit_clipping=10.0,
    )

    key = jax.random.PRNGKey(0)
    ks = jax.random.split(key, 9)
    params = {
        'Wq_first': 0.1 * jax.random.normal(ks[0], (E, E), jnp.float32),
        'Wq_last':  0.1 * jax.random.normal(ks[1], (E, E), jnp.float32),
        'Wk':       0.1 * jax.random.normal(ks[2], (E, E), jnp.float32),
        'Wv':       0.1 * jax.random.normal(ks[3], (E, E), jnp.float32),
        'alpha1':   jnp.float32(1.0),
        'alpha2':   jnp.float32(1.0),
    }

    encoded_nodes = jax.random.normal(ks[4], (B, M, E), jnp.float32)
    encoded_q1 = jax.random.normal(ks[5], (B, N, E), jnp.float32)
    encoded_last_node = jax.random.normal(ks[6], (B, N, E), jnp.float32)
    cur_dist = jax.random.uniform(ks[7], (B, N, M), jnp.float32)
    log_scale = float(jnp.log2(M))

    # mask exactly one node per (batch, query) row
    masked_idx = jax.random.randint(ks[8], (B, N), 0, M)
    one_hot = jax.nn.one_hot(masked_idx, M, dtype=jnp.float32)       # (B, N, M)
    ninf_mask_f32 = jnp.where(one_hot > 0, -jnp.inf, 0.0).astype(jnp.float32)
    ninf_mask_i8 = (one_hot > 0).astype(jnp.int8)

    ref = reference_forward(params, model_params, encoded_nodes, encoded_q1,
                            encoded_last_node, cur_dist, log_scale,
                            ninf_mask_f32)

    # 1) Full-f32 path: strict check against the reference.
    probs = tsp_decoder_forward(params, model_params, encoded_nodes, encoded_q1,
                                encoded_last_node, cur_dist, log_scale,
                                ninf_mask_f32, mm_dtype=jnp.float32)
    probs = jax.block_until_ready(probs)
    assert probs.shape == (B, N, M)
    assert jnp.allclose(jnp.sum(probs, axis=-1), 1.0, atol=5e-3)
    assert jnp.allclose(probs, ref, rtol=5e-3, atol=1e-5)

    # 2) Bandwidth-lean path (v6e/v7x recommendation): bf16 MXU operands and
    #    activation streams, bf16 cur_dist, int8 mask; f32 accumulation and
    #    elementwise math.  Compared against a reference that uses the same
    #    bf16-quantized distances so only matmul / stream rounding differs.
    cur_dist_bf16 = cur_dist.astype(jnp.bfloat16)
    ref_lean = reference_forward(params, model_params, encoded_nodes,
                                 encoded_q1, encoded_last_node,
                                 cur_dist_bf16.astype(jnp.float32),
                                 log_scale, ninf_mask_f32)
    probs_lean = tsp_decoder_forward(params, model_params, encoded_nodes,
                                     encoded_q1, encoded_last_node,
                                     cur_dist_bf16, log_scale, ninf_mask_i8,
                                     mm_dtype=jnp.bfloat16)
    probs_lean = jax.block_until_ready(probs_lean)
    assert probs_lean.shape == (B, N, M)
    assert bool(jnp.all(jnp.isfinite(probs_lean)))
    assert jnp.allclose(jnp.sum(probs_lean, axis=-1), 1.0, atol=1e-2)
    assert jnp.allclose(probs_lean, ref_lean, atol=0.1)

    print("KERNEL_OK")
</pallas_src>

<mosaic_0001>
module attributes {stable_mosaic.version = 11 : i64} {
  func.func @_decoder_kernel(%arg0: i32, %arg1: memref<2xf32, #tpu.memory_space<smem>>, %arg2: memref<1x64x32xf32, #tpu.memory_space<vmem>>, %arg3: memref<1x8x32xf32, #tpu.memory_space<vmem>>, %arg4: memref<1x8x32xf32, #tpu.memory_space<vmem>>, %arg5: memref<1x8x64xf32, #tpu.memory_space<vmem>>, %arg6: memref<1x8x64xf32, #tpu.memory_space<vmem>>, %arg7: memref<64x32xf32, #tpu.memory_space<vmem>>, %arg8: memref<32x64xf32, #tpu.memory_space<vmem>>, %arg9: memref<1x8x64xf32, #tpu.memory_space<vmem>>) attributes {dimension_semantics = [#tpu.dimension_semantics<parallel>], iteration_bounds = array<i64: 2>, scalar_prefetch = 0 : i64, scratch_operands = 0 : i64, tpu.core_type = #tpu.core_type<tc>, window_params = [{transform_indices = @transform_0, window_bounds = array<i64: 2>}, {transform_indices = @transform_1, window_bounds = array<i64: 1, 64, 32>}, {transform_indices = @transform_2, window_bounds = array<i64: 1, 8, 32>}, {transform_indices = @transform_3, window_bounds = array<i64: 1, 8, 32>}, {transform_indices = @transform_4, window_bounds = array<i64: 1, 8, 64>}, {transform_indices = @transform_5, window_bounds = array<i64: 1, 8, 64>}, {pipeline_mode = #tpu.pipeline_mode<synchronous>, transform_indices = @transform_6, window_bounds = array<i64: 64, 32>}, {pipeline_mode = #tpu.pipeline_mode<synchronous>, transform_indices = @transform_7, window_bounds = array<i64: 32, 64>}, {transform_indices = @transform_8, window_bounds = array<i64: 1, 8, 64>}]} {
    %c0 = arith.constant 0 : index
    %0 = memref.load %arg1[%c0] : memref<2xf32, #tpu.memory_space<smem>>
    %c1 = arith.constant 1 : index
    %1 = memref.load %arg1[%c1] : memref<2xf32, #tpu.memory_space<smem>>
    %c0_0 = arith.constant 0 : index
    %c0_1 = arith.constant 0 : index
    %c0_2 = arith.constant 0 : index
    %2 = vector.load %arg2[%c0_0, %c0_1, %c0_2] : memref<1x64x32xf32, #tpu.memory_space<vmem>>, vector<1x64x32xf32>
    %c0_3 = arith.constant 0 : index
    %c0_4 = arith.constant 0 : index
    %c0_5 = arith.constant 0 : index
    %3 = vector.load %arg5[%c0_3, %c0_4, %c0_5] : memref<1x8x64xf32, #tpu.memory_space<vmem>>, vector<1x8x64xf32>
    %c0_6 = arith.constant 0 : index
    %c0_7 = arith.constant 0 : index
    %c0_8 = arith.constant 0 : index
    %4 = vector.load %arg6[%c0_6, %c0_7, %c0_8] : memref<1x8x64xf32, #tpu.memory_space<vmem>>, vector<1x8x64xf32>
    %c0_9 = arith.constant 0 : index
    %c0_10 = arith.constant 0 : index
    %5 = vector.load %arg7[%c0_9, %c0_10] : memref<64x32xf32, #tpu.memory_space<vmem>>, vector<64x32xf32>
    %c0_11 = arith.constant 0 : index
    %c0_12 = arith.constant 0 : index
    %c0_13 = arith.constant 0 : index
    %6 = vector.load %arg3[%c0_11, %c0_12, %c0_13] : memref<1x8x32xf32, #tpu.memory_space<vmem>>, vector<1x8x32xf32>
    %7 = vector.shape_cast %6 : vector<1x8x32xf32> to vector<8x32xf32>
    %c0_14 = arith.constant 0 : index
    %c0_15 = arith.constant 0 : index
    %c0_16 = arith.constant 0 : index
    %8 = vector.load %arg4[%c0_14, %c0_15, %c0_16] : memref<1x8x32xf32, #tpu.memory_space<vmem>>, vector<1x8x32xf32>
    %9 = vector.shape_cast %8 : vector<1x8x32xf32> to vector<8x32xf32>
    %10 = vector.extract_strided_slice %5 {offsets = [0, 0], sizes = [32, 32], strides = [1, 1]} : vector<64x32xf32> to vector<32x32xf32>
    %cst = arith.constant dense<0.000000e+00> : vector<8x32xf32>
    %11 = tpu.matmul %7, %10, %cst {dimension_numbers = #tpu.dot_dimension_numbers<[1], [0], [0], [1], [0, 0, 1, 1], [], []>} : vector<8x32xf32>, vector<32x32xf32>, vector<8x32xf32> -> vector<8x32xf32>
    %12 = vector.extract_strided_slice %5 {offsets = [32, 0], sizes = [32, 32], strides = [1, 1]} : vector<64x32xf32> to vector<32x32xf32>
    %cst_17 = arith.constant dense<0.000000e+00> : vector<8x32xf32>
    %13 = tpu.matmul %9, %12, %cst_17 {dimension_numbers = #tpu.dot_dimension_numbers<[1], [0], [0], [1], [0, 0, 1, 1], [], []>} : vector<8x32xf32>, vector<32x32xf32>, vector<8x32xf32> -> vector<8x32xf32>
    %14 = arith.addf %11, %13 : vector<8x32xf32>
    %15 = vector.shape_cast %14 : vector<8x32xf32> to vector<1x8x32xf32>
    %16 = arith.negf %15 : vector<1x8x32xf32>
    %17 = math.exp %16 : vector<1x8x32xf32>
    %cst_18 = arith.constant 1.000000e+00 : f32
    %18 = vector.broadcast %cst_18 : f32 to vector<1x8x32xf32>
    %19 = arith.addf %18, %17 : vector<1x8x32xf32>
    %20 = arith.divf %18, %19 : vector<1x8x32xf32>
    %c0_19 = arith.constant 0 : index
    %c0_20 = arith.constant 0 : index
    %21 = vector.load %arg8[%c0_19, %c0_20] : memref<32x64xf32, #tpu.memory_space<vmem>>, vector<32x64xf32>
    %22 = vector.shape_cast %2 : vector<1x64x32xf32> to vector<64x32xf32>
    %23 = vector.extract_strided_slice %21 {offsets = [0, 0], sizes = [32, 32], strides = [1, 1]} : vector<32x64xf32> to vector<32x32xf32>
    %cst_21 = arith.constant dense<0.000000e+00> : vector<64x32xf32>
    %24 = tpu.matmul %22, %23, %cst_21 {dimension_numbers = #tpu.dot_dimension_numbers<[1], [0], [0], [1], [0, 0, 1, 1], [], []>} : vector<64x32xf32>, vector<32x32xf32>, vector<64x32xf32> -> vector<64x32xf32>
    %25 = vector.shape_cast %24 : vector<64x32xf32> to vector<1x64x32xf32>
    %26 = vector.extract_strided_slice %21 {offsets = [0, 32], sizes = [32, 32], strides = [1, 1]} : vector<32x64xf32> to vector<32x32xf32>
    %cst_22 = arith.constant dense<0.000000e+00> : vector<64x32xf32>
    %27 = tpu.matmul %22, %26, %cst_22 {dimension_numbers = #tpu.dot_dimension_numbers<[1], [0], [0], [1], [0, 0, 1, 1], [], []>} : vector<64x32xf32>, vector<32x32xf32>, vector<64x32xf32> -> vector<64x32xf32>
    %28 = vector.shape_cast %27 : vector<64x32xf32> to vector<1x64x32xf32>
    %29 = math.exp %25 : vector<1x64x32xf32>
    %30 = vector.broadcast %0 : f32 to vector<1x8x64xf32>
    %31 = arith.mulf %30, %3 : vector<1x8x64xf32>
    %32 = arith.addf %31, %4 : vector<1x8x64xf32>
    %33 = math.exp %32 : vector<1x8x64xf32>
    %34 = arith.mulf %29, %28 : vector<1x64x32xf32>
    "tpu.trace_start"() <{level = 10 : i32, message = "bnm,bme->bne"}> : () -> ()
    %cst_23 = arith.constant dense<0.000000e+00> : vector<1x8x32xf32>
    %35 = tpu.matmul %33, %34, %cst_23 {dimension_numbers = #tpu.dot_dimension_numbers<[2], [1], [1], [2], [0, 0, 0, 1, 1, 2], [0], [0]>} : vector<1x8x64xf32>, vector<1x64x32xf32>, vector<1x8x32xf32> -> vector<1x8x32xf32>
    %cst_24 = arith.constant dense<0.000000e+00> : vector<1x8x32xf32>
    %36 = tpu.matmul %33, %29, %cst_24 {dimension_numbers = #tpu.dot_dimension_numbers<[2], [1], [1], [2], [0, 0, 0, 1, 1, 2], [0], [0]>} : vector<1x8x64xf32>, vector<1x64x32xf32>, vector<1x8x32xf32> -> vector<1x8x32xf32>
    %cst_25 = arith.constant 0.000000e+00 : f32
    "tpu.trace_stop"() : () -> ()
    %37 = vector.broadcast %cst_25 : f32 to vector<1x8x32xf32>
    %38 = arith.cmpf ogt, %36, %37 : vector<1x8x32xf32>
    %39 = arith.divf %35, %36 : vector<1x8x32xf32>
    %cst_26 = arith.constant 0.000000e+00 : f32
    %40 = vector.broadcast %cst_26 : f32 to vector<1x8x32xf32>
    %41 = arith.select %38, %39, %40 : vector<1x8x32xi1>, vector<1x8x32xf32>
    %42 = arith.mulf %20, %41 : vector<1x8x32xf32>
    "tpu.trace_start"() <{level = 10 : i32, message = "bne,bme->bnm"}> : () -> ()
    %cst_27 = arith.constant dense<0.000000e+00> : vector<1x8x64xf32>
    %43 = tpu.matmul %42, %2, %cst_27 {dimension_numbers = #tpu.dot_dimension_numbers<[2], [2], [1], [1], [0, 0, 0, 1, 1, 1], [0], [0]>} : vector<1x8x32xf32>, vector<1x64x32xf32>, vector<1x8x64xf32> -> vector<1x8x64xf32>
    "tpu.trace_stop"() : () -> ()
    %cst_28 = arith.constant 0.176776692 : f32
    %44 = vector.broadcast %cst_28 : f32 to vector<1x8x64xf32>
    %45 = arith.mulf %43, %44 : vector<1x8x64xf32>
    %46 = vector.broadcast %1 : f32 to vector<1x8x64xf32>
    %47 = arith.mulf %46, %3 : vector<1x8x64xf32>
    %48 = arith.subf %45, %47 : vector<1x8x64xf32>
    %49 = math.tanh %48 : vector<1x8x64xf32>
    %cst_29 = arith.constant 1.000000e+01 : f32
    %50 = vector.broadcast %cst_29 : f32 to vector<1x8x64xf32>
    %51 = arith.mulf %50, %49 : vector<1x8x64xf32>
    %52 = arith.addf %51, %4 : vector<1x8x64xf32>
    %cst_30 = arith.constant dense<0xFF800000> : vector<1x8xf32>
    %53 = vector.multi_reduction <maximumf>, %52, %cst_30 [2] : vector<1x8x64xf32> to vector<1x8xf32>
    %54 = vector.shape_cast %53 : vector<1x8xf32> to vector<1x8x1xf32>
    %55 = vector.broadcast %54 : vector<1x8x1xf32> to vector<1x8x64xf32>
    %56 = arith.subf %52, %55 : vector<1x8x64xf32>
    %57 = math.exp %56 : vector<1x8x64xf32>
    %cst_31 = arith.constant dense<0.000000e+00> : vector<1x8xf32>
    %58 = vector.multi_reduction <add>, %57, %cst_31 [2] : vector<1x8x64xf32> to vector<1x8xf32>
    %59 = vector.shape_cast %58 : vector<1x8xf32> to vector<1x8x1xf32>
    %60 = tpu.reciprocal %59 {approx = true} : vector<1x8x1xf32> -> vector<1x8x1xf32>
    %61 = vector.broadcast %60 : vector<1x8x1xf32> to vector<1x8x64xf32>
    %62 = arith.mulf %57, %61 : vector<1x8x64xf32>
    %c0_32 = arith.constant 0 : index
    %c0_33 = arith.constant 0 : index
    %c0_34 = arith.constant 0 : index
    %63 = vector.load %arg9[%c0_32, %c0_33, %c0_34] : memref<1x8x64xf32, #tpu.memory_space<vmem>>, vector<1x8x64xf32>
    tpu.vector_store %arg9[%c0_32, %c0_33, %c0_34], %62 {strides = array<i32>} : memref<1x8x64xf32, #tpu.memory_space<vmem>>, vector<1x8x64xf32>,
    return
  }
  func.func @transform_0(%arg0: i32) -> i32 {
    %c0_i32 = arith.constant 0 : i32
    %c0_i32_0 = arith.constant 0 : i32
    return %c0_i32 : i32
  }
  func.func @transform_1(%arg0: i32) -> (i32, i32, i32) {
    %c0_i32 = arith.constant 0 : i32
    %c0_i32_0 = arith.constant 0 : i32
    %c0_i32_1 = arith.constant 0 : i32
    return %arg0, %c0_i32, %c0_i32_0 : i32, i32, i32
  }
  func.func @transform_2(%arg0: i32) -> (i32, i32, i32) {
    %c0_i32 = arith.constant 0 : i32
    %c0_i32_0 = arith.constant 0 : i32
    %c0_i32_1 = arith.constant 0 : i32
    return %arg0, %c0_i32, %c0_i32_0 : i32, i32, i32
  }
  func.func @transform_3(%arg0: i32) -> (i32, i32, i32) {
    %c0_i32 = arith.constant 0 : i32
    %c0_i32_0 = arith.constant 0 : i32
    %c0_i32_1 = arith.constant 0 : i32
    return %arg0, %c0_i32, %c0_i32_0 : i32, i32, i32
  }
  func.func @transform_4(%arg0: i32) -> (i32, i32, i32) {
    %c0_i32 = arith.constant 0 : i32
    %c0_i32_0 = arith.constant 0 : i32
    %c0_i32_1 = arith.constant 0 : i32
    return %arg0, %c0_i32, %c0_i32_0 : i32, i32, i32
  }
  func.func @transform_5(%arg0: i32) -> (i32, i32, i32) {
    %c0_i32 = arith.constant 0 : i32
    %c0_i32_0 = arith.constant 0 : i32
    %c0_i32_1 = arith.constant 0 : i32
    return %arg0, %c0_i32, %c0_i32_0 : i32, i32, i32
  }
  func.func @transform_6(%arg0: i32) -> (i32, i32) {
    %c0_i32 = arith.constant 0 : i32
    %c0_i32_0 = arith.constant 0 : i32
    %c0_i32_1 = arith.constant 0 : i32
    return %c0_i32, %c0_i32_0 : i32, i32
  }
  func.func @transform_7(%arg0: i32) -> (i32, i32) {
    %c0_i32 = arith.constant 0 : i32
    %c0_i32_0 = arith.constant 0 : i32
    %c0_i32_1 = arith.constant 0 : i32
    return %c0_i32, %c0_i32_0 : i32, i32
  }
  func.func @transform_8(%arg0: i32) -> (i32, i32, i32) {
    %c0_i32 = arith.constant 0 : i32
    %c0_i32_0 = arith.constant 0 : i32
    %c0_i32_1 = arith.constant 0 : i32
    return %arg0, %c0_i32, %c0_i32_0 : i32, i32, i32
  }
}

</mosaic_0001>

<bundles_post_ra>
// kernel: tpu_custom_call.1
= control target key start
LH: loop header
LB: loop body
LE: loop exit
PB: predicated region body
PF: predicated region fallthrough
CT: control target
= control target key end

     0   :  { %13 = vsyncpa [#allocation4], 0  ;;  %s2030_s0 = inlined_call_operand.vmem [shape: f32[2], index: 0, kind: input, shape index: {}]   ;;  %s2031_s1 = inlined_call_operand.vmem [shape: f32[2,64,32], index: 1, kind: input, shape index: {}]   ;;  %s2032_s2 = inlined_call_operand.vmem [shape: f32[2,8,32], index: 2, kind: input, shape index: {}]   ;;  %s2033_s3 = inlined_call_operand.vmem [shape: f32[2,8,32], index: 3, kind: input, shape index: {}]   ;;  %s2034_s4 = inlined_call_operand.vmem [shape: f32[2,8,64], index: 4, kind: input, shape index: {}]   ;;  %s2035_s5 = inlined_call_operand.vmem [shape: f32[2,8,64], index: 5, kind: input, shape index: {}]   ;;  %s2036_s6 = inlined_call_operand.vmem [shape: f32[64,32], index: 6, kind: input, shape index: {}]   ;;  %s2037_s7 = inlined_call_operand.vmem [shape: f32[32,64], index: 7, kind: input, shape index: {}]   ;;  %s2038_s8 = inlined_call_operand.hbm [shape: f32[2,8,64], index: 8, kind: output, shape index: {}]  }
   0x1   :  { %14 = vsyncpa [#allocation3], 0 }
   0x2   :  { %16 = vsyncpa [#allocation3 + $0x1], 0  ;;  %s1745_s27 = smov 0   ;;  %s1747_s28 = smov 0  }
   0x3   :  { %s1749_s29 = smov 0   ;;  %s1751_s30 = smov 0  }
   0x4 LB: > { %s1766_s9 = sadd.s32 4294967295, %s1692_s30   ;;  %s1218_s10 = sadd.s32 4294967294, %s1692_s30   ;;  %s1692_s30 = sphi %s1751_s30, %s2045_s30   ;;  %s1688_s29 = sphi %s1749_s29, %s2044_s29   ;;  %s1684_s28 = sphi %s1747_s28, %s2043_s28   ;;  %s1680_s27 = sphi %s1745_s27, %s2042_s27  }
   0x5   : > { %s1770_s11 = sadd.s32 1, %s1692_s30   ;;  %s222_s12 = sadd.s32 1, %s1688_s29 }
   0x6   : > { %s219_s13 = ssub.s32 %s1692_s30, %s1770_s11  ;;  %p232_p0 = scmp.ne.s32.totalorder %s1688_s29, %s1684_s28 }
   0x7   : > { %p220_p1 = scmp.eq.s32.totalorder %s219_s13, 0  ;;  %p233_p2 = scmp.eq.s32.totalorder %s1766_s9, 1 }
   0x8   : > { %p238_p3 = scmp.ne.s32.totalorder %s1684_s28, %s1680_s27  ;;  %p239_p4 = scmp.eq.s32.totalorder %s1218_s10, 1 }
   0x9   : > { %s1781_s14 = scalar_select %p220_p1, %s1688_s29, %s222_s12  }
   0xa   : > { %p1783_p5 = por %p233_p2, %p232_p0  ;;  %p1787_p6 = por %p239_p4, %p238_p3 }
   0xb   : > { %p1219_p7 = scmp.ge.s32.totalorder %s1692_s30, 1  ;;  %p246_p8 = scmp.lt.s32.totalorder %s1692_s30, 3 }
   0xc   : > { %p1531_p9 = scmp.eq.s32.totalorder %s1766_s9, 0  ;;  %s259_s20 = sshll.u32 %s2030_s0, 4  ;;  %s260_s20 = int_to_ptr.vmem [resolvable:$true] %s259_s20 }
   0xd   : > { %p1794_p10 = pnand %p1219_p7, %p246_p8  ;;  %s1611_s21 = scalar_lea.vmem %s260_s20, 16 }
   0xe   : > { %p1612_p13 = scmp.ne.s32.totalorder %s260_s20, %s1611_s21  ;;  %p1619_p3 = scmp.lt.s32.totalorder %s260_s20, %s260_s20 }
   0xf   : > { %p1523_p11 = pneg %p1794_p10  ;;  %p1620_p4 = scmp.lt.s32.totalorder %s1611_s21, %s1611_s21 }
  0x11   : > { %p1524_p12 = pnand %p1531_p9, %p1523_p11  ;;  %p1621_p7 = por %p1620_p4, %p1619_p3 }
  0x13   : > { %p1613_p0 = pneg %p1524_p12 }
  0x15   : > { %p1614_p1 = pnand %p1613_p0, %p1612_p13 }
  0x17   : > { %p1615_p2 = pneg %p1614_p1 }
  0x19   : > { %p1622_p8 = pnand %p1621_p7, %p1615_p2 }
  0x1b   : > { %1625 = shalt.err (!%p1622_p8)
}
  0x1c   : > { %s1694_s22 = smov [#allocation2]   ;;  %314 = sbr.rel (%p1794_p10) target bundleno = 1176 (0x498), region = 52 }
  0x1d   : > { %1526 = dma.vmem_to_smem (!%p1524_p12), %s260_s20, 16, %s1694_s22, [#allocation4]  }
  0x23   : > { %1671 = dma.done.wait (%p1531_p9), [#allocation4], 16  }
  0x24   : > { %1673 = vsyncadd (%p1531_p9), [#allocation4], 4294967280 }
  0x25   : > { %320 = sfence }
  0x26   : > { %v561_v0 = vld [vmem:[%s2037_s7] sm:$0xff]  ;;  %v562_v1 = vld [vmem:[%s2037_s7 + $0x8] sm:$0xff]  ;;  %v563_v2 = vld [vmem:[%s2037_s7 + $0x10] sm:$0xff]  ;;  %v1695_v5 = vmov 0.0|0.0   ;;  %p365_p9 = scmp.lt.s32.totalorder %s1766_s9, 1  ;;  %vm1696_vm0 = vmmov 0  }
  0x27   : > { %v1571_v3 = vpack.i.bf16 %v562_v1, %v561_v0  ;;  %v564_v4 = vld [vmem:[%s2037_s7 + $0x18] sm:$0xff]  ;;  %1447 = vmatprep.subr.bf16.mxu0 %v1695_v5  ;;  %v402_v6 = vld [vmem:[%s2036_s6 + $0x20] sm:$0xff]  ;;  %v403_v7 = vld [vmem:[%s2036_s6 + $0x28] sm:$0xff]  ;;  %v1459_v8 = vpack.c.bf16 %v562_v1, %v561_v0  ;;  %v1697_v13 = vmov 0.0   ;;  %s1698_s26 = smov 96   ;;  %vm408_vm1 = vcmask 261120  }
  0x28   : > { %v1448_v9 = vpack.c.bf16 %v403_v7, %v402_v6  ;;  %v404_v10 = vld [vmem:[%s2036_s6 + $0x30] sm:$0xff]  ;;  %v405_v11 = vld [vmem:[%s2036_s6 + $0x38] sm:$0xff]  ;;  %v1463_v12 = vpack.c.bf16 %v564_v4, %v563_v2  ;;  %1336 = vmatprep.mubr.msk.f32.mxu0 %vm1696_vm0, %v1697_v13  ;;  %v1576_v14 = vpack.i.bf16 %v564_v4, %v563_v2  ;;  %s366_s10 = scalar_select %p365_p9, %s1766_s9, 1  ;;  %v398_v16 = vld [vmem:[%s2036_s6] sm:$0xff]  ;;  %vm844_vm2 = vcmask 523264  }
  0x29   : > { %1572 = vrot.lane.b32.xlu0 %v1571_v3, %s1698_s26  ;;  %1460 = vmatprep.subr.bf16.mxu1 %v1459_v8  ;;  %v1451_v15 = vpack.c.bf16 %v405_v11, %v404_v10  ;;  %v399_v17 = vld [vmem:[%s2036_s6 + $0x8] sm:$0xff]  ;;  %v400_v23 = vld [vmem:[%s2036_s6 + $0x10] sm:$0xff]  ;;  %v401_v24 = vld [vmem:[%s2036_s6 + $0x18] sm:$0xff]  ;;  %s386_s22 = sld [smem:[#allocation2]]  ;;  %s362_s17 = sand.u32 1, %s1684_s28  }
  0x2a   : > { %1449 = vmatpush3.bf16.msra.mxu0 %v1448_v9  ;;  %1462 = vmatpush3.bf16.msra.mxu1 %v1459_v8  ;;  %s1266_s12 = sshll.u32 %s366_s10, 6  ;;  %s1841_s13 = sshll.u32 %s366_s10, 3  ;;  %v1454_v20 = vpack.c.bf16 %v399_v17, %v398_v16  ;;  %v1457_v25 = vpack.c.bf16 %v401_v24, %v400_v23  ;;  %vm1501_vm3 = vmpackc.low %vm408_vm1, %vm408_vm1 }
  0x2b   : > { %1450 = vmatprep.subr.bf16.mxu0 %v1695_v5  ;;  %1464 = vmatprep.subr.bf16.mxu1 %v1463_v12  ;;  %s1852_s23 = scalar_lea.vmem %s2031_s1, %s1266_s12  ;;  %s377_s10 = scalar_lea.vmem %s2033_s3, %s1841_s13 }
  0x2c   : > { %v1859_v18 = vld [vmem:[%s1852_s23] sm:$0xff]  ;;  %v1862_v21 = vld [vmem:[%s1852_s23 + $0x8] sm:$0xff]  ;;  %v1868_v22 = vld [vmem:[%s1852_s23 + $0x10] sm:$0xff]  ;;  %s373_s21 = scalar_lea.vmem %s2032_s2, %s1841_s13  ;;  %s381_s25 = scalar_lea.vmem %s2034_s4, %s1841_s13 }
  0x2d   : > { %1577 = vrot.lane.b32.xlu0 %v1576_v14, %s1698_s26  ;;  %v407_v19 = vld [vmem:[%s377_s10] sm:$0xff]  ;;  %1358 = vmatprep.mubr.msk.f32.mxu1 %vm408_vm1, %v1859_v18  ;;  %v1883_v26 = vld [vmem:[%s1852_s23 + $0x18] sm:$0xff]  ;;  %v1900_v29 = vld [vmem:[%s1852_s23 + $0x28] sm:$0xff]  ;;  %s385_s26 = scalar_lea.vmem %s2035_s5, %s1841_s13  ;;  %s1231_s13 = sld [smem:[#allocation2 + $0x1]] }
  0x2e   : > { %1452 = vmatpush3.bf16.msra.mxu0 %v1451_v15  ;;  %1466 = vmatpush3.bf16.msra.mxu1 %v1463_v12  ;;  %v1893_v27 = vld [vmem:[%s1852_s23 + $0x20] sm:$0xff]  ;;  %v1903_v30 = vld [vmem:[%s1852_s23 + $0x30] sm:$0xff]  ;;  %v1911_v31 = vld [vmem:[%s1852_s23 + $0x38] sm:$0xff]  ;;  %s1224_s18 = sshll.u32 %s362_s17, 3  ;;  %s1263_s19 = sshll.u32 %s1766_s9, 7 }
  0x2f   : > { %1453 = vmatprep.subr.bf16.mxu0 %v1695_v5  ;;  %1475 = vmatprep.subr.bf16.mxu1 %v1695_v5  ;;  %v406_v28 = vld [vmem:[%s373_s21] sm:$0xff]  ;;  %v831_v46 = vstv %s386_s22  ;;  %s364_s20 = scalar_lea.vmem [#allocation5], %s1224_s18  ;;  %s1987_s24 = scalar_lea.hbm %s2038_s8, %s1263_s19 }
  0x30   : > { %v1940_v45 = vld [vmem:[%s381_s25] sm:$0xff]  ;;  %s1099_s21 = sshll.u32 %s364_s20, 4  ;;  %s1086_s25 = scalar_lea.sflag [#allocation3], %s362_s17  ;;  %s1989_s21 = int_to_ptr.vmem [resolvable:$true] %s1099_s21 }
  0x31   : > { %1337 = vmatmul.mubr.msk.f32.vlgmr.msra.gmra.mrb[0].mxu0 %vm408_vm1, %v407_v19  ;;  %1359 = vmatmul.mubr.msk.f32.vlgmr.msra.gmra.mrb[0].mxu1 %vm408_vm1, %v1862_v21  ;;  %v832_v50 = vmul.f32 %v831_v46, %v1940_v45  ;;  %v1949_v53 = vld [vmem:[%s385_s26] sm:$0xff]  ;;  %v1508_v46 = vpack.c.bf16 %v1900_v29, %v1893_v27  ;;  %s1626_s10 = scalar_lea.vmem %s1989_s21, 128  ;;  %s1699_s9 = smov [#allocation5]  }
  0x32   : > { %1455 = vmatpush3.bf16.msra.mxu0 %v1454_v20  ;;  %1361 = vmatprep.mubr.msk.f32.mxu1 %vm408_vm1, %v1868_v22  ;;  %p1627_p10 = scmp.ne.s32.totalorder %s1989_s21, %s1626_s10  ;;  %s1630_s12 = sshll.u32 %s1699_s9, 4  ;;  %s1631_s12 = int_to_ptr.vmem [resolvable:$false] %s1630_s12 }
  0x33   : > { %1456 = vmatprep.subr.bf16.mxu0 %v1695_v5  ;;  %1347 = vmatprep.mubr.msk.f32.mxu0 %vm1696_vm0, %v1697_v13  ;;  %v833_v58 = vadd.f32 %v832_v50, %v1949_v53  ;;  %s1632_s26 = scalar_lea.vmem %s1631_s12, 256  ;;  %p1633_p13 = scmp.lt.s32.totalorder %s1989_s21, %s1631_s12 }
  0x34   : > { %p1628_p11 = pnand %p1627_p10, %p1783_p5  ;;  %p1634_p0 = scmp.lt.s32.totalorder %s1632_s26, %s1626_s10 }
  0x35   : > { %1362 = vmatmul.mubr.msk.f32.gmra.mrb[2].mxu1 %vm408_vm1, %v1883_v26  ;;  %v834_v2 = vmul.f32 1.442695, %v833_v58 }
  0x36   : > { %1458 = vmatpush3.bf16.msra.mxu0 %v1457_v25  ;;  %1364 = vmatprep.mubr.msk.f32.mxu1 %vm408_vm1, %v1893_v27  ;;  %p1629_p12 = pneg %p1628_p11  ;;  %p1635_p1 = por %p1634_p0, %p1633_p13 }
  0x38   : > { %p1636_p2 = pnand %p1635_p1, %p1629_p12 }
  0x39   : > { %1348 = vmatmul.mubr.msk.f32.vlgmr.msra.gmra.mrb[0].mxu0 %vm408_vm1, %v406_v28  ;;  %1365 = vmatmul.mubr.msk.f32.gmra.mrb[4].mxu1 %vm408_vm1, %v1900_v29 }
  0x3a   : > { %1367 = vmatprep.mubr.msk.f32.mxu1 %vm408_vm1, %v1903_v30  ;;  %1378 = vmatprep.mubr.msk.f32.mxu0 %vm408_vm1, %v1859_v18 }
  0x3d   : > { %1368 = vmatmul.mubr.msk.f32.gmra.mrb[6].mxu1 %vm408_vm1, %v1911_v31 }
  0x3e   : > { %1406 = vmatprep.mubr.msk.f32.mxu1 %vm1696_vm0, %v1697_v13 }
  0x9b   : > { %v1573_v32 = vpop.permute.xlu0 %1572 }
  0x9c   : > { %v1575_v33 = vunpack.i.h.bf16 %v1573_v32  ;;  %v1574_v34 = vunpack.i.l.bf16 %v1573_v32 }
  0x9e   : > { %v1467_v35 = vpack.c.bf16 %v1575_v33, %v1574_v34 }
  0x9f   : > { %v1578_v36 = vpop.permute.xlu0 %1577 }
  0xa0   : > { %v1580_v37 = vunpack.i.h.bf16 %v1578_v36  ;;  %v1579_v38 = vunpack.i.l.bf16 %v1578_v36  ;;  %1468 = vmatprep.subr.bf16.mxu0 %v1467_v35 }
  0xa1   : > { %1470 = vmatpush3.bf16.msra.mxu0 %v1467_v35 }
  0xa2   : > { %v1471_v39 = vpack.c.bf16 %v1580_v37, %v1579_v38 }
  0xa4   : > { %1472 = vmatprep.subr.bf16.mxu0 %v1471_v39 }
  0xa5   : > { %1474 = vmatpush3.bf16.msra.mxu0 %v1471_v39 }
  0xa6   : > { %1487 = vmatprep.subr.bf16.mxu0 %v1695_v5 }
  0xa8   : > { %1379 = vmatmul.mubr.msk.f32.vlgmr.msra.gmra.mrb[2].mxu0 %vm408_vm1, %v1862_v21 }
  0xa9   : > { %1381 = vmatprep.mubr.msk.f32.mxu0 %vm408_vm1, %v1868_v22 }
  0xac   : > { %1382 = vmatmul.mubr.msk.f32.gmra.mrb[4].mxu0 %vm408_vm1, %v1883_v26 }
  0xad   : > { %1384 = vmatprep.mubr.msk.f32.mxu0 %vm408_vm1, %v1893_v27 }
  0xb0   : > { %1385 = vmatmul.mubr.msk.f32.gmra.mrb[6].mxu0 %vm408_vm1, %v1900_v29 }
  0xb1   : > { %1387 = vmatprep.mubr.msk.f32.mxu0 %vm408_vm1, %v1903_v30 }
  0xb4   : > { %1388 = vmatmul.mubr.msk.f32.gmra.mrb[8].mxu0 %vm408_vm1, %v1911_v31 }
  0xb5   : > { %1425 = vmatprep.mubr.msk.f32.mxu0 %vm1696_vm0, %v1697_v13 }
 0x104   : > { %v1360_v40 = vpop.f32.mrb[0].mxu1 }
 0x105   : > { %v817_v41 = vmul.f32 1.442695, %v1360_v40  ;;  %v655_v42 = vpop.f32.mrb[1].mxu1 }
 0x106   : > { %v815_v43 = vmul.f32 1.442695, %v655_v42 }
 0x107   : > { %1581 = vpow2.f32 %v817_v41 }
 0x108   : > { %1583 = vpow2.f32 %v815_v43  ;;  %v1363_v44 = vpop.f32.mrb[2].mxu1  ;;  %v1500_v43 = vpack.c.bf16 %v1862_v21, %v1859_v18 }
 0x109   : > { %v821_v47 = vmul.f32 1.442695, %v1363_v44  ;;  %v665_v48 = vpop.f32.mrb[3].mxu1  ;;  %v1504_v44 = vpack.c.bf16 %v1883_v26, %v1868_v22 }
 0x10a   : > { %v819_v49 = vmul.f32 1.442695, %v665_v48 }
 0x10b   : > { %1585 = vpow2.f32 %v821_v47 }
 0x10c   : > { %1587 = vpow2.f32 %v819_v49  ;;  %v1947_v51 = vpop.f32.mrb[0].mxu0  ;;  %v1366_v52 = vpop.f32.mrb[4].mxu1 }
 0x10d   : > { %v1349_v54 = vpop.f32.mrb[1].mxu0  ;;  %v825_v55 = vmul.f32 1.442695, %v1366_v52  ;;  %v675_v56 = vpop.f32.mrb[5].mxu1  ;;  %v1234_v47 = vmul.f32 -1.442695, %v1947_v51 }
 0x10e   : > { %v823_v57 = vmul.f32 1.442695, %v675_v56 }
 0x10f   : > { %1589 = vpow2.f32 %v825_v55 }
 0x110   : > { %v1369_v59 = vpop.f32.mrb[6].mxu1  ;;  %1591 = vpow2.f32 %v823_v57 }
 0x111   : > { %v1582_v60 = vpop.eup %1581  ;;  %v829_v61 = vmul.f32 1.442695, %v1369_v59  ;;  %v685_v62 = vpop.f32.mrb[7].mxu1 }
 0x112   : > { %v1584_v63 = vpop.eup %1583  ;;  %v827_v0 = vmul.f32 1.442695, %v685_v62 }
 0x113   : > { %1593 = vpow2.f32 %v829_v61  ;;  %v1488_v1 = vpack.c.bf16 %v1582_v60, %v1584_v63 }
 0x114   : > { %1595 = vpow2.f32 %v827_v0 }
 0x115   : > { %v1586_v3 = vpop.eup %1585  ;;  %1489 = vmatpush3.bf16.msra.mxu0 %v1488_v1  ;;  %1597 = vpow2.f32 %v834_v2 }
 0x116   : > { %v1588_v4 = vpop.eup %1587  ;;  %1490 = vmatprep.subr.bf16.mxu0 %v1695_v5  ;;  %1599 = vpow2.f32 %v1234_v47 }
 0x117   : > { %v1491_v6 = vpack.c.bf16 %v1586_v3, %v1588_v4 }
 0x119   : > { %1492 = vmatpush3.bf16.msra.mxu0 %v1491_v6  ;;  %v1590_v7 = vpop.eup %1589 }
 0x11a   : > { %1493 = vmatprep.subr.bf16.mxu0 %v1695_v5  ;;  %v1592_v8 = vpop.eup %1591 }
 0x11b   : > { %v1494_v9 = vpack.c.bf16 %v1590_v7, %v1592_v8 }
 0x11d   : > { %v1594_v10 = vpop.eup %1593  ;;  %1495 = vmatpush3.bf16.msra.mxu0 %v1494_v9 }
 0x11e   : > { %v1596_v11 = vpop.eup %1595  ;;  %1496 = vmatprep.subr.bf16.mxu0 %v1695_v5 }
 0x11f   : > { %v1497_v12 = vpack.c.bf16 %v1594_v10, %v1596_v11  ;;  %v1598_v14 = vpop.eup %1597 }
 0x120   : > { %v1600_v48 = vpop.eup %1599 }
 0x121   : > { %1498 = vmatpush3.bf16.msra.mxu0 %v1497_v12  ;;  %v558_v22 = vadd.f32 1.0, %v1600_v48 }
 0x124   : > { %1426 = vmatmul.mubr.msk.f32.vlgmr.msra.gmra.mrb[10].mxu0 %vm844_vm2, %v1598_v14 }
 0x17b   : > { %v1380_v15 = vpop.f32.mrb[2].mxu0 }
 0x17c   : > { %v837_v16 = vmul.f32 %v1582_v60, %v1380_v15  ;;  %v776_v17 = vpop.f32.mrb[3].mxu0 }
 0x17d   : > { %v836_v19 = vmul.f32 %v1584_v63, %v776_v17 }
 0x17f   : > { %v1476_v20 = vpack.c.bf16 %v837_v16, %v836_v19  ;;  %v1383_v23 = vpop.f32.mrb[4].mxu0 }
 0x180   : > { %v839_v24 = vmul.f32 %v1586_v3, %v1383_v23  ;;  %v786_v25 = vpop.f32.mrb[5].mxu0 }
 0x181   : > { %v838_v28 = vmul.f32 %v1588_v4, %v786_v25  ;;  %1477 = vmatpush3.bf16.msra.mxu1 %v1476_v20 }
 0x182   : > { %1478 = vmatprep.subr.bf16.mxu1 %v1695_v5 }
 0x183   : > { %v1479_v32 = vpack.c.bf16 %v839_v24, %v838_v28  ;;  %v1386_v33 = vpop.f32.mrb[6].mxu0 }
 0x184   : > { %v841_v34 = vmul.f32 %v1590_v7, %v1386_v33  ;;  %v796_v35 = vpop.f32.mrb[7].mxu0 }
 0x185   : > { %v840_v36 = vmul.f32 %v1592_v8, %v796_v35  ;;  %1480 = vmatpush3.bf16.msra.mxu1 %v1479_v32 }
 0x186   : > { %1481 = vmatprep.subr.bf16.mxu1 %v1695_v5 }
 0x187   : > { %v1482_v37 = vpack.c.bf16 %v841_v34, %v840_v36  ;;  %v1389_v38 = vpop.f32.mrb[8].mxu0 }
 0x188   : > { %v843_v39 = vmul.f32 %v1594_v10, %v1389_v38  ;;  %v806_v40 = vpop.f32.mrb[9].mxu0 }
 0x189   : > { %v842_v41 = vmul.f32 %v1596_v11, %v806_v40  ;;  %1483 = vmatpush3.bf16.msra.mxu1 %v1482_v37 }
 0x18a   : > { %1484 = vmatprep.subr.bf16.mxu1 %v1695_v5 }
 0x18b   : > { %v1485_v42 = vpack.c.bf16 %v843_v39, %v842_v41 }
 0x18d   : > { %1486 = vmatpush3.bf16.msra.mxu1 %v1485_v42 }
 0x18e   : > { %1499 = vmatprep.subr.bf16.mxu1 %v1695_v5 }
 0x190   : > { %1407 = vmatmul.mubr.msk.f32.vlgmr.msra.gmra.mrb[8].mxu1 %vm844_vm2, %v1598_v14 }
 0x191   : > { %1444 = vmatprep.mubr.msk.f32.mxu1 %vm1696_vm0, %v1697_v13  ;;  %v1512_v13 = vpack.c.bf16 %v1911_v31, %v1903_v30  ;;  %v1067_v30 = vstv %s1231_s13 }
 0x192   : > { %v1068_v31 = vmul.f32 %v1067_v30, %v1940_v45 }
 0x196   : > { %1502 = vmatpush3.bf16.xpose.msk.msra.mxu1 %vm1501_vm3, %v1500_v43 }
 0x197   : > { %1503 = vmatprep.subr.bf16.mxu1 %v1695_v5 }
 0x19e   : > { %1506 = vmatpush3.bf16.xpose.msk.msra.mxu1 %vm1501_vm3, %v1504_v44 }
 0x19f   : > { %1507 = vmatprep.subr.bf16.mxu1 %v1695_v5 }
 0x1a6   : > { %1510 = vmatpush3.bf16.xpose.msk.msra.mxu1 %vm1501_vm3, %v1508_v46 }
 0x1a7   : > { %1511 = vmatprep.subr.bf16.mxu1 %v1695_v5 }
 0x1ae   : > { %1514 = vmatpush3.bf16.xpose.msk.msra.mxu1 %vm1501_vm3, %v1512_v13 }
 0x1f7   : > { %v984_v18 = vpop.f32.mrb[10].mxu0 }
 0x1f8   : > { %v1427_v21 = vpop.f32.mrb[11].mxu0  ;;  %1601 = vrcp.f32 %v984_v18  ;;  %vm988_vm4 = vcmp.gt.f32.partialorder %v984_v18, 0.0 }
 0x1f9   : > { %1603 = vrcp.f32 %v558_v22 }
 0x202   : > { %v1602_v26 = vpop.eup %1601 }
 0x203   : > { %v1604_v29 = vpop.eup %1603 }
 0x263   : > { %v914_v49 = vpop.f32.mrb[8].mxu1 }
 0x264   : > { %v990_v50 = vmul.f32 %v1602_v26, %v914_v49  ;;  %v1408_v27 = vpop.f32.mrb[9].mxu1 }
 0x266   : > { %v991_v5 = vsel %vm988_vm4, %v990_v50, 0.0 }
 0x267   : > { %v992_v52 = vmul.f32 %v1604_v29, %v991_v5 }
 0x269   : > { %1445 = vmatmul.mubr.msk.f32.vlgmr.msra.gmra.mrb[10].mxu1 %vm408_vm1, %v992_v52 }
 0x33c   : > { %v1062_v51 = vpop.f32.mrb[10].mxu1 }
 0x33d   : > { %v1066_v54 = vmul.f32 0.17677669, %v1062_v51  ;;  %v1446_v55 = vpop.f32.mrb[11].mxu1 }
 0x33f   : > { %v1069_v56 = vsub.f32 %v1066_v54, %v1068_v31 }
 0x341   : > { %1605 = vtanh.f32 %v1069_v56 }
 0x34b   : > { %v1606_v57 = vpop.eup %1605 }
 0x34c   : > { %v1071_v58 = vmul.f32 10.0, %v1606_v57 }
 0x34e   : > { %v1072_v59 = vadd.f32 %v1071_v58, %v1949_v53 }
 0x350   : > { %v1073_v60 = vsel %vm844_vm2, %v1072_v59, -inf }
 0x351   : > { %1074 = vmax.xlane.f32.xlu1 %v1073_v60 }
 0x3de   : > { %v1075_v61 = vpop.xlane.xlu1 %1074 }
 0x3df   : > { %v1076_v62 = vsub.f32 %v1072_v59, %v1075_v61 }
 0x3e1   : > { %v1077_v63 = vmul.f32 1.442695, %v1076_v62 }
 0x3e3   : > { %1607 = vpow2.f32 %v1077_v63 }
 0x3ed   : > { %v1608_v0 = vpop.eup %1607 }
 0x3ee   : > { %v1079_v45 = vsel %vm844_vm2, %v1608_v0, 0.0 }
 0x3ef   : > { %1080 = vadd.xlane.f32.xlu1 %v1079_v45 }
 0x47c   : > { %v1081_v1 = vpop.xlane.xlu1 %1080 }
 0x47d   : > { %1609 = vrcp.f32 %v1081_v1 }
 0x487   : > { %v1610_v53 = vpop.eup %1609 }
 0x488   : > { %v1083_v2 = vmul.f32 %v1610_v53, %v1608_v0 }
 0x48a   : > { %1084 = vst.msk [vmem:[%s364_s20] sm:$0xff] %vm844_vm2, %v1083_v2 }
 0x48b   : > { %1639 = shalt.err (!%p1636_p2)
}
 0x48c   : > { %s1640_s13 = scalar_lea.hbm %s1987_s24, 128  ;;  %s1644_s19 = scalar_lea.hbm %s2038_s8, 256 }
 0x48d   : > { %p1641_p3 = scmp.ne.s32.totalorder %s1987_s24, %s1640_s13  ;;  %p1645_p8 = scmp.lt.u32.totalorder %s1987_s24, %s2038_s8 }
 0x48e   : > { %p1646_p9 = scmp.lt.u32.totalorder %s1644_s19, %s1640_s13  ;;  %p1648_p11 = scmp.lt.u32.totalorder %s1640_s13, %s1987_s24 }
 0x48f   : > { %p1642_p4 = pnand %p1641_p3, %p1783_p5 }
 0x490   : > { %p1647_p10 = por %p1646_p9, %p1645_p8 }
 0x491   : > { %p1643_p7 = pneg %p1642_p4 }
 0x492   : > { %p1649_p12 = por %p1648_p11, %p1647_p10 }
 0x494   : > { %p1650_p13 = pnand %p1649_p12, %p1643_p7 }
 0x496   : > { %1653 = shalt.err (!%p1650_p13)
}
 0x497   : > { %1521 = dma.vmem_to_hbm [thread:$0]  (%p1783_p5), %s1989_s21, 128, %s1987_s24, %s1086_s25  }
 0x498 PF: > { %p1533_p0 = scmp.ge.s32.totalorder %s1692_s30, 2  ;;  %s1111_s23 = sand.u32 1, %s1680_s27  }
 0x499   : > { %s1112_s10 = scalar_lea.sflag [#allocation3], %s1111_s23 }
 0x49a   : > { %p1528_p1 = pnand %p1533_p0, %p1787_p6 }
 0x49c   : > { %1675 = dma.done.wait (!%p1528_p1), %s1112_s10, 128  }
 0x49d   : > { %1677 = vsyncadd (!%p1528_p1), %s1112_s10, 4294967168  ;;  %p19_p2 = scmp.ge.s32.totalorder %s1770_s11, 4   ;;  %s2042_s27 = smov %s1684_s28 }
 0x49e   : > { %s2043_s28 = smov %s1688_s29  ;;  %s2044_s29 = smov %s1781_s14 }
 0x49f   : > { %s2045_s30 = smov %s1770_s11  ;;  %21 = sbr.rel (!%p19_p2) target bundleno = 4 (0x4), region = 104 }
 0x4a6   :  { %1117 = vsyncpa [#allocation3], 1 }
 0x4a7   :  { %1119 = vsyncpa [#allocation3 + $0x1], 1 }
 0x4a8   :  { %1120 = vsyncpa [#allocation4], 1 }
 0x4a9   :  { %1122 = vsyncpa [#allocation4 + $0x1], 1 }

</bundles_post_ra>
